<compile_context>
chip_gen: v7x
topology: tpu7x:2x2x1
jax: 0.10.0
libtpu: 0.0.40
codegen_flags: <defaults>
</compile_context>

<pallas_src>
import jax
import jax.numpy as jnp
from jax.experimental import pallas as pl
from jax.experimental.pallas import tpu as pltpu

NF_IN, NF_HID, NF_OUT = 3, 5, 2
LANE = 128
SUBLANE = 8
ROW = SUBLANE * LANE  # 1024: minimum batch-tile granule (full f32 vregs)


def _mlp_kernel(w1_ref, b1_ref, w2_ref, b2_ref, x_ref, o_ref):
    # x_ref: (3, TR, 128) VMEM tile; o_ref: (2, TR, 128) VMEM tile.
    # w1_ref: (5, 3), b1_ref: (5,), w2_ref: (2, 5), b2_ref: (2,) scalars in SMEM.
    x0 = x_ref[0]  # (TR, 128) full slabs -> whole-vreg VPU ops
    x1 = x_ref[1]
    x2 = x_ref[2]

    acc0 = None
    acc1 = None
    # fc1 + ReLU fused with fc2: per hidden unit, compute h_j and immediately
    # consume it into the two output accumulators (only 2 tile-sized lives).
    for j in range(NF_HID):
        h = jnp.maximum(
            w1_ref[j, 0] * x0 + w1_ref[j, 1] * x1 + w1_ref[j, 2] * x2 + b1_ref[j],
            0.0,
        )
        t0 = w2_ref[0, j] * h
        t1 = w2_ref[1, j] * h
        acc0 = t0 if acc0 is None else acc0 + t0
        acc1 = t1 if acc1 is None else acc1 + t1

    o_ref[0] = acc0 + b2_ref[0]
    o_ref[1] = acc1 + b2_ref[1]


def simple_net_forward(x, w1, b1, w2, b2, *, tb=128 * 1024):
    """x: (B, 3) f32; PyTorch-layout params: w1 (5,3), b1 (5,), w2 (2,5), b2 (2,).

    Returns (B, 2) f32 == fc2(relu(fc1(x))).
    tb = batch elements per grid step (rounded to a multiple of 1024). Memory-bound:
    ~64K-128K is enough for v5e, 128K-256K for v6e, 256K-512K for v7x.
    """
    B = x.shape[0]

    # Tile size: multiple of 8*128 elements; shrink to the (padded) batch if tiny.
    tb = max(ROW, (tb // ROW) * ROW)
    bp_min = ((B + ROW - 1) // ROW) * ROW
    tb = min(tb, bp_min)
    bp = ((B + tb - 1) // tb) * tb          # padded batch, multiple of tb
    grid = (bp // tb,)
    R = bp // LANE                           # total sublane rows
    TR = tb // LANE                          # sublane rows per tile (multiple of 8)

    xf = x.astype(jnp.float32)
    if bp == B:
        # Fast path: no materialized zero-pad, just relayout to (3, R, 128).
        xt = xf.T.reshape(NF_IN, R, LANE)
    else:
        xt = (
            jnp.zeros((NF_IN, bp), jnp.float32)
            .at[:, :B]
            .set(xf.T)
            .reshape(NF_IN, R, LANE)
        )

    smem = pltpu.MemorySpace.SMEM
    out_t = pl.pallas_call(
        _mlp_kernel,
        out_shape=jax.ShapeDtypeStruct((NF_OUT, R, LANE), jnp.float32),
        grid=grid,
        in_specs=[
            pl.BlockSpec(memory_space=smem),                       # w1 scalars
            pl.BlockSpec(memory_space=smem),                       # b1 scalars
            pl.BlockSpec(memory_space=smem),                       # w2 scalars
            pl.BlockSpec(memory_space=smem),                       # b2 scalars
            pl.BlockSpec((NF_IN, TR, LANE), lambda i: (0, i, 0)),  # x tile (pipelined)
        ],
        out_specs=pl.BlockSpec((NF_OUT, TR, LANE), lambda i: (0, i, 0)),
        compiler_params=pltpu.CompilerParams(
            dimension_semantics=("parallel",),     # independent batch tiles (2 TCs on v7x)
            vmem_limit_bytes=48 * 1024 * 1024,     # headroom on v7x's 64 MiB, safe on v5e/v6e
        ),
    )(
        w1.astype(jnp.float32),
        b1.astype(jnp.float32),
        w2.astype(jnp.float32),
        b2.astype(jnp.float32),
        xt,
    )

    # Padded lanes hold b2 + W2.relu(b1); they are sliced off here.
    return out_t.reshape(NF_OUT, bp)[:, :B].T


def init_params(key):
    """Deterministic init mimicking PyTorch nn.Linear default (U[-1/sqrt(fan_in), +])."""
    k1, k2, k3, k4 = jax.random.split(key, 4)
    bound1 = 1.0 / jnp.sqrt(3.0)
    bound2 = 1.0 / jnp.sqrt(5.0)
    w1 = jax.random.uniform(k1, (NF_HID, NF_IN), jnp.float32, -bound1, bound1)
    b1 = jax.random.uniform(k2, (NF_HID,), jnp.float32, -bound1, bound1)
    w2 = jax.random.uniform(k3, (NF_OUT, NF_HID), jnp.float32, -bound2, bound2)
    b2 = jax.random.uniform(k4, (NF_OUT,), jnp.float32, -bound2, bound2)
    return w1, b1, w2, b2


def _reference(x, w1, b1, w2, b2):
    # Pure-JAX reference of the PyTorch forward: fc2(relu(fc1(x))).
    return jnp.maximum(x @ w1.T + b1, 0.0) @ w2.T + b2


if __name__ == "__main__":
    key = jax.random.PRNGKey(0)
    kx, kp, kx2 = jax.random.split(key, 3)
    w1, b1, w2, b2 = init_params(kp)

    # Small batch (single tile, padded path).
    batch = 8
    x = jax.random.normal(kx, (batch, NF_IN), jnp.float32)
    out = jax.block_until_ready(simple_net_forward(x, w1, b1, w2, b2))
    ref = _reference(x, w1, b1, w2, b2)
    assert out.shape == (batch, NF_OUT)
    assert jnp.allclose(out, ref, atol=1e-5, rtol=1e-5), "mismatch vs reference (small)"

    # Larger, non-multiple batch with a small tile to exercise the multi-step grid path.
    batch2 = 2700
    x2 = jax.random.normal(kx2, (batch2, NF_IN), jnp.float32)
    out2 = jax.block_until_ready(simple_net_forward(x2, w1, b1, w2, b2, tb=1024))
    ref2 = _reference(x2, w1, b1, w2, b2)
    assert out2.shape == (batch2, NF_OUT)
    assert jnp.allclose(out2, ref2, atol=1e-5, rtol=1e-5), "mismatch vs reference (grid)"

    print("KERNEL_OK")
</pallas_src>

<mosaic_0001>
module attributes {stable_mosaic.version = 11 : i64} {
  func.func @_mlp_kernel(%arg0: i32, %arg1: memref<5x3xf32, #tpu.memory_space<smem>>, %arg2: memref<5xf32, #tpu.memory_space<smem>>, %arg3: memref<2x5xf32, #tpu.memory_space<smem>>, %arg4: memref<2xf32, #tpu.memory_space<smem>>, %arg5: memref<3x8x128xf32, #tpu.memory_space<vmem>>, %arg6: memref<2x8x128xf32, #tpu.memory_space<vmem>>) attributes {dimension_semantics = [#tpu.dimension_semantics<parallel>], iteration_bounds = array<i64: 1>, scalar_prefetch = 0 : i64, scratch_operands = 0 : i64, tpu.core_type = #tpu.core_type<tc>, window_params = [{transform_indices = @transform_0, window_bounds = array<i64: 5, 3>}, {transform_indices = @transform_1, window_bounds = array<i64: 5>}, {transform_indices = @transform_2, window_bounds = array<i64: 2, 5>}, {transform_indices = @transform_3, window_bounds = array<i64: 2>}, {transform_indices = @transform_4, window_bounds = array<i64: 3, 8, 128>}, {transform_indices = @transform_5, window_bounds = array<i64: 2, 8, 128>}]} {
    %c0 = arith.constant 0 : index
    %c0_0 = arith.constant 0 : index
    %c0_1 = arith.constant 0 : index
    %0 = vector.load %arg5[%c0, %c0_0, %c0_1] : memref<3x8x128xf32, #tpu.memory_space<vmem>>, vector<1x8x128xf32>
    %1 = vector.shape_cast %0 : vector<1x8x128xf32> to vector<8x128xf32>
    %c1 = arith.constant 1 : index
    %c0_2 = arith.constant 0 : index
    %c0_3 = arith.constant 0 : index
    %2 = vector.load %arg5[%c1, %c0_2, %c0_3] : memref<3x8x128xf32, #tpu.memory_space<vmem>>, vector<1x8x128xf32>
    %3 = vector.shape_cast %2 : vector<1x8x128xf32> to vector<8x128xf32>
    %c2 = arith.constant 2 : index
    %c0_4 = arith.constant 0 : index
    %c0_5 = arith.constant 0 : index
    %4 = vector.load %arg5[%c2, %c0_4, %c0_5] : memref<3x8x128xf32, #tpu.memory_space<vmem>>, vector<1x8x128xf32>
    %5 = vector.shape_cast %4 : vector<1x8x128xf32> to vector<8x128xf32>
    %c0_6 = arith.constant 0 : index
    %c0_7 = arith.constant 0 : index
    %6 = memref.load %arg1[%c0_6, %c0_7] : memref<5x3xf32, #tpu.memory_space<smem>>
    %7 = vector.broadcast %6 : f32 to vector<8x128xf32>
    %8 = arith.mulf %7, %1 : vector<8x128xf32>
    %c0_8 = arith.constant 0 : index
    %c1_9 = arith.constant 1 : index
    %9 = memref.load %arg1[%c0_8, %c1_9] : memref<5x3xf32, #tpu.memory_space<smem>>
    %10 = vector.broadcast %9 : f32 to vector<8x128xf32>
    %11 = arith.mulf %10, %3 : vector<8x128xf32>
    %12 = arith.addf %8, %11 : vector<8x128xf32>
    %c0_10 = arith.constant 0 : index
    %c2_11 = arith.constant 2 : index
    %13 = memref.load %arg1[%c0_10, %c2_11] : memref<5x3xf32, #tpu.memory_space<smem>>
    %14 = vector.broadcast %13 : f32 to vector<8x128xf32>
    %15 = arith.mulf %14, %5 : vector<8x128xf32>
    %16 = arith.addf %12, %15 : vector<8x128xf32>
    %c0_12 = arith.constant 0 : index
    %17 = memref.load %arg2[%c0_12] : memref<5xf32, #tpu.memory_space<smem>>
    %18 = vector.broadcast %17 : f32 to vector<8x128xf32>
    %19 = arith.addf %16, %18 : vector<8x128xf32>
    %cst = arith.constant 0.000000e+00 : f32
    %20 = vector.broadcast %cst : f32 to vector<8x128xf32>
    %21 = arith.maximumf %19, %20 : vector<8x128xf32>
    %c0_13 = arith.constant 0 : index
    %c0_14 = arith.constant 0 : index
    %22 = memref.load %arg3[%c0_13, %c0_14] : memref<2x5xf32, #tpu.memory_space<smem>>
    %23 = vector.broadcast %22 : f32 to vector<8x128xf32>
    %24 = arith.mulf %23, %21 : vector<8x128xf32>
    %c1_15 = arith.constant 1 : index
    %c0_16 = arith.constant 0 : index
    %25 = memref.load %arg3[%c1_15, %c0_16] : memref<2x5xf32, #tpu.memory_space<smem>>
    %26 = vector.broadcast %25 : f32 to vector<8x128xf32>
    %27 = arith.mulf %26, %21 : vector<8x128xf32>
    %c1_17 = arith.constant 1 : index
    %c0_18 = arith.constant 0 : index
    %28 = memref.load %arg1[%c1_17, %c0_18] : memref<5x3xf32, #tpu.memory_space<smem>>
    %29 = vector.broadcast %28 : f32 to vector<8x128xf32>
    %30 = arith.mulf %29, %1 : vector<8x128xf32>
    %c1_19 = arith.constant 1 : index
    %c1_20 = arith.constant 1 : index
    %31 = memref.load %arg1[%c1_19, %c1_20] : memref<5x3xf32, #tpu.memory_space<smem>>
    %32 = vector.broadcast %31 : f32 to vector<8x128xf32>
    %33 = arith.mulf %32, %3 : vector<8x128xf32>
    %34 = arith.addf %30, %33 : vector<8x128xf32>
    %c1_21 = arith.constant 1 : index
    %c2_22 = arith.constant 2 : index
    %35 = memref.load %arg1[%c1_21, %c2_22] : memref<5x3xf32, #tpu.memory_space<smem>>
    %36 = vector.broadcast %35 : f32 to vector<8x128xf32>
    %37 = arith.mulf %36, %5 : vector<8x128xf32>
    %38 = arith.addf %34, %37 : vector<8x128xf32>
    %c1_23 = arith.constant 1 : index
    %39 = memref.load %arg2[%c1_23] : memref<5xf32, #tpu.memory_space<smem>>
    %40 = vector.broadcast %39 : f32 to vector<8x128xf32>
    %41 = arith.addf %38, %40 : vector<8x128xf32>
    %cst_24 = arith.constant 0.000000e+00 : f32
    %42 = vector.broadcast %cst_24 : f32 to vector<8x128xf32>
    %43 = arith.maximumf %41, %42 : vector<8x128xf32>
    %c0_25 = arith.constant 0 : index
    %c1_26 = arith.constant 1 : index
    %44 = memref.load %arg3[%c0_25, %c1_26] : memref<2x5xf32, #tpu.memory_space<smem>>
    %45 = vector.broadcast %44 : f32 to vector<8x128xf32>
    %46 = arith.mulf %45, %43 : vector<8x128xf32>
    %c1_27 = arith.constant 1 : index
    %c1_28 = arith.constant 1 : index
    %47 = memref.load %arg3[%c1_27, %c1_28] : memref<2x5xf32, #tpu.memory_space<smem>>
    %48 = vector.broadcast %47 : f32 to vector<8x128xf32>
    %49 = arith.mulf %48, %43 : vector<8x128xf32>
    %50 = arith.addf %24, %46 : vector<8x128xf32>
    %51 = arith.addf %27, %49 : vector<8x128xf32>
    %c2_29 = arith.constant 2 : index
    %c0_30 = arith.constant 0 : index
    %52 = memref.load %arg1[%c2_29, %c0_30] : memref<5x3xf32, #tpu.memory_space<smem>>
    %53 = vector.broadcast %52 : f32 to vector<8x128xf32>
    %54 = arith.mulf %53, %1 : vector<8x128xf32>
    %c2_31 = arith.constant 2 : index
    %c1_32 = arith.constant 1 : index
    %55 = memref.load %arg1[%c2_31, %c1_32] : memref<5x3xf32, #tpu.memory_space<smem>>
    %56 = vector.broadcast %55 : f32 to vector<8x128xf32>
    %57 = arith.mulf %56, %3 : vector<8x128xf32>
    %58 = arith.addf %54, %57 : vector<8x128xf32>
    %c2_33 = arith.constant 2 : index
    %c2_34 = arith.constant 2 : index
    %59 = memref.load %arg1[%c2_33, %c2_34] : memref<5x3xf32, #tpu.memory_space<smem>>
    %60 = vector.broadcast %59 : f32 to vector<8x128xf32>
    %61 = arith.mulf %60, %5 : vector<8x128xf32>
    %62 = arith.addf %58, %61 : vector<8x128xf32>
    %c2_35 = arith.constant 2 : index
    %63 = memref.load %arg2[%c2_35] : memref<5xf32, #tpu.memory_space<smem>>
    %64 = vector.broadcast %63 : f32 to vector<8x128xf32>
    %65 = arith.addf %62, %64 : vector<8x128xf32>
    %cst_36 = arith.constant 0.000000e+00 : f32
    %66 = vector.broadcast %cst_36 : f32 to vector<8x128xf32>
    %67 = arith.maximumf %65, %66 : vector<8x128xf32>
    %c0_37 = arith.constant 0 : index
    %c2_38 = arith.constant 2 : index
    %68 = memref.load %arg3[%c0_37, %c2_38] : memref<2x5xf32, #tpu.memory_space<smem>>
    %69 = vector.broadcast %68 : f32 to vector<8x128xf32>
    %70 = arith.mulf %69, %67 : vector<8x128xf32>
    %c1_39 = arith.constant 1 : index
    %c2_40 = arith.constant 2 : index
    %71 = memref.load %arg3[%c1_39, %c2_40] : memref<2x5xf32, #tpu.memory_space<smem>>
    %72 = vector.broadcast %71 : f32 to vector<8x128xf32>
    %73 = arith.mulf %72, %67 : vector<8x128xf32>
    %74 = arith.addf %50, %70 : vector<8x128xf32>
    %75 = arith.addf %51, %73 : vector<8x128xf32>
    %c3 = arith.constant 3 : index
    %c0_41 = arith.constant 0 : index
    %76 = memref.load %arg1[%c3, %c0_41] : memref<5x3xf32, #tpu.memory_space<smem>>
    %77 = vector.broadcast %76 : f32 to vector<8x128xf32>
    %78 = arith.mulf %77, %1 : vector<8x128xf32>
    %c3_42 = arith.constant 3 : index
    %c1_43 = arith.constant 1 : index
    %79 = memref.load %arg1[%c3_42, %c1_43] : memref<5x3xf32, #tpu.memory_space<smem>>
    %80 = vector.broadcast %79 : f32 to vector<8x128xf32>
    %81 = arith.mulf %80, %3 : vector<8x128xf32>
    %82 = arith.addf %78, %81 : vector<8x128xf32>
    %c3_44 = arith.constant 3 : index
    %c2_45 = arith.constant 2 : index
    %83 = memref.load %arg1[%c3_44, %c2_45] : memref<5x3xf32, #tpu.memory_space<smem>>
    %84 = vector.broadcast %83 : f32 to vector<8x128xf32>
    %85 = arith.mulf %84, %5 : vector<8x128xf32>
    %86 = arith.addf %82, %85 : vector<8x128xf32>
    %c3_46 = arith.constant 3 : index
    %87 = memref.load %arg2[%c3_46] : memref<5xf32, #tpu.memory_space<smem>>
    %88 = vector.broadcast %87 : f32 to vector<8x128xf32>
    %89 = arith.addf %86, %88 : vector<8x128xf32>
    %cst_47 = arith.constant 0.000000e+00 : f32
    %90 = vector.broadcast %cst_47 : f32 to vector<8x128xf32>
    %91 = arith.maximumf %89, %90 : vector<8x128xf32>
    %c0_48 = arith.constant 0 : index
    %c3_49 = arith.constant 3 : index
    %92 = memref.load %arg3[%c0_48, %c3_49] : memref<2x5xf32, #tpu.memory_space<smem>>
    %93 = vector.broadcast %92 : f32 to vector<8x128xf32>
    %94 = arith.mulf %93, %91 : vector<8x128xf32>
    %c1_50 = arith.constant 1 : index
    %c3_51 = arith.constant 3 : index
    %95 = memref.load %arg3[%c1_50, %c3_51] : memref<2x5xf32, #tpu.memory_space<smem>>
    %96 = vector.broadcast %95 : f32 to vector<8x128xf32>
    %97 = arith.mulf %96, %91 : vector<8x128xf32>
    %98 = arith.addf %74, %94 : vector<8x128xf32>
    %99 = arith.addf %75, %97 : vector<8x128xf32>
    %c4 = arith.constant 4 : index
    %c0_52 = arith.constant 0 : index
    %100 = memref.load %arg1[%c4, %c0_52] : memref<5x3xf32, #tpu.memory_space<smem>>
    %101 = vector.broadcast %100 : f32 to vector<8x128xf32>
    %102 = arith.mulf %101, %1 : vector<8x128xf32>
    %c4_53 = arith.constant 4 : index
    %c1_54 = arith.constant 1 : index
    %103 = memref.load %arg1[%c4_53, %c1_54] : memref<5x3xf32, #tpu.memory_space<smem>>
    %104 = vector.broadcast %103 : f32 to vector<8x128xf32>
    %105 = arith.mulf %104, %3 : vector<8x128xf32>
    %106 = arith.addf %102, %105 : vector<8x128xf32>
    %c4_55 = arith.constant 4 : index
    %c2_56 = arith.constant 2 : index
    %107 = memref.load %arg1[%c4_55, %c2_56] : memref<5x3xf32, #tpu.memory_space<smem>>
    %108 = vector.broadcast %107 : f32 to vector<8x128xf32>
    %109 = arith.mulf %108, %5 : vector<8x128xf32>
    %110 = arith.addf %106, %109 : vector<8x128xf32>
    %c4_57 = arith.constant 4 : index
    %111 = memref.load %arg2[%c4_57] : memref<5xf32, #tpu.memory_space<smem>>
    %112 = vector.broadcast %111 : f32 to vector<8x128xf32>
    %113 = arith.addf %110, %112 : vector<8x128xf32>
    %cst_58 = arith.constant 0.000000e+00 : f32
    %114 = vector.broadcast %cst_58 : f32 to vector<8x128xf32>
    %115 = arith.maximumf %113, %114 : vector<8x128xf32>
    %c0_59 = arith.constant 0 : index
    %c4_60 = arith.constant 4 : index
    %116 = memref.load %arg3[%c0_59, %c4_60] : memref<2x5xf32, #tpu.memory_space<smem>>
    %117 = vector.broadcast %116 : f32 to vector<8x128xf32>
    %118 = arith.mulf %117, %115 : vector<8x128xf32>
    %c1_61 = arith.constant 1 : index
    %c4_62 = arith.constant 4 : index
    %119 = memref.load %arg3[%c1_61, %c4_62] : memref<2x5xf32, #tpu.memory_space<smem>>
    %120 = vector.broadcast %119 : f32 to vector<8x128xf32>
    %121 = arith.mulf %120, %115 : vector<8x128xf32>
    %122 = arith.addf %98, %118 : vector<8x128xf32>
    %123 = arith.addf %99, %121 : vector<8x128xf32>
    %c0_63 = arith.constant 0 : index
    %124 = memref.load %arg4[%c0_63] : memref<2xf32, #tpu.memory_space<smem>>
    %125 = vector.broadcast %124 : f32 to vector<8x128xf32>
    %126 = arith.addf %122, %125 : vector<8x128xf32>
    %c0_64 = arith.constant 0 : index
    %c0_65 = arith.constant 0 : index
    %c0_66 = arith.constant 0 : index
    %127 = vector.load %arg6[%c0_64, %c0_65, %c0_66] : memref<2x8x128xf32, #tpu.memory_space<vmem>>, vector<1x8x128xf32>
    %128 = vector.shape_cast %127 : vector<1x8x128xf32> to vector<8x128xf32>
    %129 = vector.shape_cast %126 : vector<8x128xf32> to vector<1x8x128xf32>
    tpu.vector_store %arg6[%c0_64, %c0_65, %c0_66], %129 {strides = array<i32>} : memref<2x8x128xf32, #tpu.memory_space<vmem>>, vector<1x8x128xf32>,
    %c1_67 = arith.constant 1 : index
    %130 = memref.load %arg4[%c1_67] : memref<2xf32, #tpu.memory_space<smem>>
    %131 = vector.broadcast %130 : f32 to vector<8x128xf32>
    %132 = arith.addf %123, %131 : vector<8x128xf32>
    %c1_68 = arith.constant 1 : index
    %c0_69 = arith.constant 0 : index
    %c0_70 = arith.constant 0 : index
    %133 = vector.load %arg6[%c1_68, %c0_69, %c0_70] : memref<2x8x128xf32, #tpu.memory_space<vmem>>, vector<1x8x128xf32>
    %134 = vector.shape_cast %133 : vector<1x8x128xf32> to vector<8x128xf32>
    %135 = vector.shape_cast %132 : vector<8x128xf32> to vector<1x8x128xf32>
    tpu.vector_store %arg6[%c1_68, %c0_69, %c0_70], %135 {strides = array<i32>} : memref<2x8x128xf32, #tpu.memory_space<vmem>>, vector<1x8x128xf32>,
    return
  }
  func.func @transform_0(%arg0: i32) -> (i32, i32) {
    %c0_i32 = arith.constant 0 : i32
    %c0_i32_0 = arith.constant 0 : i32
    %c0_i32_1 = arith.constant 0 : i32
    return %c0_i32, %c0_i32_0 : i32, i32
  }
  func.func @transform_1(%arg0: i32) -> i32 {
    %c0_i32 = arith.constant 0 : i32
    %c0_i32_0 = arith.constant 0 : i32
    return %c0_i32 : i32
  }
  func.func @transform_2(%arg0: i32) -> (i32, i32) {
    %c0_i32 = arith.constant 0 : i32
    %c0_i32_0 = arith.constant 0 : i32
    %c0_i32_1 = arith.constant 0 : i32
    return %c0_i32, %c0_i32_0 : i32, i32
  }
  func.func @transform_3(%arg0: i32) -> i32 {
    %c0_i32 = arith.constant 0 : i32
    %c0_i32_0 = arith.constant 0 : i32
    return %c0_i32 : i32
  }
  func.func @transform_4(%arg0: i32) -> (i32, i32, i32) {
    %c0_i32 = arith.constant 0 : i32
    %c0_i32_0 = arith.constant 0 : i32
    %c0_i32_1 = arith.constant 0 : i32
    return %c0_i32, %arg0, %c0_i32_0 : i32, i32, i32
  }
  func.func @transform_5(%arg0: i32) -> (i32, i32, i32) {
    %c0_i32 = arith.constant 0 : i32
    %c0_i32_0 = arith.constant 0 : i32
    %c0_i32_1 = arith.constant 0 : i32
    return %c0_i32, %arg0, %c0_i32_0 : i32, i32, i32
  }
}

</mosaic_0001>

<bundles_post_ra>
// kernel: tpu_custom_call.1
= control target key start
LH: loop header
LB: loop body
LE: loop exit
PB: predicated region body
PF: predicated region fallthrough
CT: control target
= control target key end

     0   :  { %10 = vsyncpa [#allocation5], 0  ;;  %s498_s0 = inlined_call_operand.vmem [shape: f32[5,3], index: 0, kind: input, shape index: {}]   ;;  %s499_s1 = inlined_call_operand.vmem [shape: f32[5], index: 1, kind: input, shape index: {}]   ;;  %s500_s2 = inlined_call_operand.vmem [shape: f32[2,5], index: 2, kind: input, shape index: {}]   ;;  %s501_s3 = inlined_call_operand.hbm [shape: f32[2], index: 3, kind: input, shape index: {}]   ;;  %s502_s4 = inlined_call_operand.vmem [shape: f32[3,8,128], index: 4, kind: input, shape index: {}]   ;;  %s503_s5 = inlined_call_operand.hbm [shape: f32[2,8,128], index: 5, kind: output, shape index: {}]  }
   0x1   :  { %11 = vsyncpa [#allocation7], 0 }
   0x2   :  { %12 = vsyncpa [#allocation4], 0  ;;  %s30_s20 = sshll.u32 %s499_s1, 4  ;;  %s31_s20 = int_to_ptr.vmem [resolvable:$true] %s30_s20 }
   0x3   :  { %13 = vsyncpa [#allocation3], 0  ;;  %s20_s23 = sshll.u32 %s498_s0, 4  ;;  %s250_s24 = scalar_lea.vmem %s31_s20, 16  ;;  %s21_s23 = int_to_ptr.vmem [resolvable:$true] %s20_s23 }
   0x4   :  { %p251_p0 = scmp.ne.s32.totalorder %s31_s20, %s250_s24  ;;  %p255_p1 = scmp.lt.s32.totalorder %s31_s20, %s31_s20 }
   0x5   :  { %p256_p2 = scmp.lt.s32.totalorder %s250_s24, %s250_s24 }
   0x7   :  { %p257_p3 = por %p256_p2, %p255_p1 }
   0x9   :  { %p258_p4 = pnand %p257_p3, %p251_p0 }
   0xb   :  { %261 = shalt.err (!%p258_p4)
}
   0xc   :  { %s326_s25 = smov [#allocation6]   ;;  %s262_s26 = scalar_lea.vmem %s21_s23, 128 }
   0xd   :  { %33 = dma.vmem_to_smem %s31_s20, 16, %s326_s25, [#allocation7]  }
   0xe   :  { %p263_p5 = scmp.ne.s32.totalorder %s21_s23, %s262_s26  ;;  %p267_p6 = scmp.lt.s32.totalorder %s21_s23, %s21_s23 }
   0xf   :  { %p268_p7 = scmp.lt.s32.totalorder %s262_s26, %s262_s26 }
  0x11   :  { %p269_p8 = por %p268_p7, %p267_p6 }
  0x13   :  { %p270_p9 = pnand %p269_p8, %p263_p5 }
  0x15   :  { %273 = shalt.err (!%p270_p9)
}
  0x16   :  { %s327_s1 = smov [#allocation2]   ;;  %s40_s28 = sshll.u32 %s500_s2, 4  ;;  %s41_s28 = int_to_ptr.vmem [resolvable:$true] %s40_s28 }
  0x17   :  { %23 = dma.vmem_to_smem %s21_s23, 128, %s327_s1, [#allocation5]  }
  0x18   :  { %s274_s29 = scalar_lea.vmem %s41_s28, 32  ;;  %p279_p11 = scmp.lt.s32.totalorder %s41_s28, %s41_s28 }
  0x19   :  { %p275_p10 = scmp.ne.s32.totalorder %s41_s28, %s274_s29  ;;  %p280_p12 = scmp.lt.s32.totalorder %s274_s29, %s274_s29 }
  0x1b   :  { %p281_p13 = por %p280_p12, %p279_p11 }
  0x1d   :  { %p282_p0 = pnand %p281_p13, %p275_p10 }
  0x1f   :  { %285 = shalt.err (!%p282_p0)
}
  0x20   :  { %s328_s30 = smov [#allocation8]   ;;  %s286_s8 = scalar_lea.hbm %s501_s3, 16 }
  0x21   :  { %43 = dma.vmem_to_smem %s41_s28, 32, %s328_s30, [#allocation7]  }
  0x22   :  { %p287_p1 = scmp.ne.s32.totalorder %s501_s3, %s286_s8  ;;  %p290_p2 = scmp.lt.u32.totalorder %s286_s8, %s501_s3 }
  0x24   :  { %p292_p3 = pnand %p290_p2, %p287_p1 }
  0x26   :  { %295 = shalt.err (!%p292_p3)
}
  0x27   :  { %s329_s12 = smov [#allocation9]  }
  0x28   :  { %51 = dma.hbm_to_smem %s501_s3, 16, %s329_s12, [#allocation4]  }
  0x29   :  { %318 = dma.done.wait [#allocation5], 128  }
  0x2a   :  { %319 = vsyncadd [#allocation5], 4294967168 }
  0x2b   :  { %320 = dma.done.wait [#allocation7], 48  }
  0x2c   :  { %321 = vsyncadd [#allocation7], 4294967248 }
  0x2d   :  { %322 = dma.done.wait [#allocation4], 16  }
  0x2e   :  { %323 = vsyncadd [#allocation4], 4294967280 }
  0x2f   :  { %66 = sfence }
  0x30   :  { %s72_s15 = sld [smem:[#allocation2]]  ;;  %s215_s16 = sld [smem:[#allocation2 + $0x1]]  ;;  %v391_v0 = vld [vmem:[%s502_s4] sm:$0xff]  ;;  %v396_v1 = vld [vmem:[%s502_s4 + $0x8] sm:$0xff]  ;;  %v401_v2 = vld [vmem:[%s502_s4 + $0x10] sm:$0xff] }
  0x31   :  { %s216_s17 = sld [smem:[#allocation2 + $0x2]]  ;;  %s384_s18 = sld [smem:[#allocation6]] }
  0x32   :  { %s386_s19 = sld [smem:[#allocation8]]  ;;  %s219_s21 = sld [smem:[#allocation2 + $0x81]] }
  0x33   :  { %s218_s20 = sld [smem:[#allocation2 + $0x80]]  ;;  %s220_s3 = sld [smem:[#allocation2 + $0x82]] }
  0x34   :  { %s403_s0 = sld [smem:[#allocation6 + $0x1]]  ;;  %s405_s27 = sld [smem:[#allocation2 + $0x100]] }
  0x35   :  { %s407_s28 = sld [smem:[#allocation2 + $0x101]]  ;;  %s409_s29 = sld [smem:[#allocation2 + $0x102]] }
  0x36   :  { %v73_v3 = vstv %s72_s15  ;;  %v76_v5 = vstv %s215_s16  ;;  %s412_s30 = sld [smem:[#allocation8 + $0x1]]  ;;  %s414_s6 = sld [smem:[#allocation6 + $0x2]] }
  0x37   :  { %v74_v4 = vmul.f32 %v73_v3, %v391_v0  ;;  %v80_v6 = vstv %s216_s17  ;;  %v77_v7 = vmul.f32 %v396_v1, %v76_v5  ;;  %s418_s4 = sld [smem:[#allocation2 + $0x180]]  ;;  %s420_s7 = sld [smem:[#allocation2 + $0x181]]  ;;  %v84_v15 = vstv %s384_s18 }
  0x38   :  { %v81_v8 = vmul.f32 %v401_v2, %v80_v6  ;;  %v97_v10 = vstv %s219_s21  ;;  %s422_s8 = sld [smem:[#allocation8 + $0x2]]  ;;  %s428_s10 = sld [smem:[#allocation6 + $0x3]]  ;;  %v88_v16 = vstv %s386_s19 }
  0x39   :  { %v94_v9 = vstv %s218_s20  ;;  %s424_s9 = sld [smem:[#allocation2 + $0x182]]  ;;  %v78_v11 = vadd.f32 %v77_v7, %v74_v4  ;;  %v98_v13 = vmul.f32 %v396_v1, %v97_v10  ;;  %v101_v14 = vstv %s220_s3  ;;  %s430_s11 = sld [smem:[#allocation2 + $0x200]] }
  0x3a   :  { %v95_v12 = vmul.f32 %v94_v9, %v391_v0  ;;  %v102_v17 = vmul.f32 %v401_v2, %v101_v14  ;;  %v117_v18 = vstv %s405_s27  ;;  %s436_s2 = sld [smem:[#allocation2 + $0x201]]  ;;  %s438_s12 = sld [smem:[#allocation2 + $0x202]]  ;;  %v105_v23 = vstv %s403_s0 }
  0x3b   :  { %v82_v19 = vadd.f32 %v81_v8, %v78_v11  ;;  %v118_v21 = vmul.f32 %v117_v18, %v391_v0  ;;  %v120_v22 = vstv %s407_s28  ;;  %s442_s13 = sld [smem:[#allocation8 + $0x3]]  ;;  %v124_v25 = vstv %s409_s29  ;;  %s448_s14 = sld [smem:[#allocation6 + $0x4]] }
  0x3c   :  { %v99_v20 = vadd.f32 %v98_v13, %v95_v12  ;;  %v121_v24 = vmul.f32 %v396_v1, %v120_v22  ;;  %v128_v26 = vstv %s414_s6  ;;  %s450_s15 = sld [smem:[#allocation8 + $0x80]]  ;;  %v125_v29 = vmul.f32 %v401_v2, %v124_v25  ;;  %s454_s16 = sld [smem:[#allocation8 + $0x81]] }
  0x3d   :  { %v85_v27 = vadd.f32 %v84_v15, %v82_v19  ;;  %v140_v30 = vstv %s418_s4  ;;  %v143_v33 = vstv %s420_s7  ;;  %s459_s17 = sld [smem:[#allocation8 + $0x82]]  ;;  %s461_s18 = sld [smem:[#allocation8 + $0x83]]  ;;  %v109_v39 = vstv %s412_s30 }
  0x3e   :  { %v103_v28 = vadd.f32 %v102_v17, %v99_v20  ;;  %v122_v31 = vadd.f32 %v121_v24, %v118_v21  ;;  %v141_v32 = vmul.f32 %v140_v30, %v391_v0  ;;  %v144_v37 = vmul.f32 %v396_v1, %v143_v33  ;;  %s472_s19 = sld [smem:[#allocation8 + $0x4]]  ;;  %s185_s21 = sld [smem:[#allocation9]] }
  0x3f   :  { %v147_v34 = vstv %s424_s9  ;;  %v86_v35 = vmax.f32 %v85_v27, 0.0  ;;  %v132_v41 = vstv %s422_s8  ;;  %v163_v42 = vstv %s430_s11  ;;  %s474_s20 = sld [smem:[#allocation8 + $0x84]]  ;;  %s242_s22 = sld [smem:[#allocation9 + $0x1]] }
  0x40   :  { %v106_v36 = vadd.f32 %v105_v23, %v103_v28  ;;  %v148_v38 = vmul.f32 %v401_v2, %v147_v34  ;;  %v126_v40 = vadd.f32 %v125_v29, %v122_v31  ;;  %v145_v45 = vadd.f32 %v144_v37, %v141_v32  ;;  %s330_s23 = smov [#allocation10]  }
  0x41   :  { %v89_v43 = vmul.f32 %v88_v16, %v86_v35  ;;  %v164_v46 = vmul.f32 %v163_v42, %v391_v0  ;;  %v151_v48 = vstv %s428_s10  ;;  %v166_v49 = vstv %s436_s2  ;;  %s199_s3 = sshll.u32 %s330_s23, 4  ;;  %s200_s3 = int_to_ptr.vmem [resolvable:$true] %s199_s3 }
  0x42   :  { %v107_v44 = vmax.f32 %v106_v36, 0.0  ;;  %v129_v47 = vadd.f32 %v128_v26, %v126_v40  ;;  %v170_v50 = vstv %s438_s12  ;;  %v149_v52 = vadd.f32 %v148_v38, %v145_v45  ;;  %s296_s24 = scalar_lea.vmem %s200_s3, 256  ;;  %p301_p5 = scmp.lt.s32.totalorder %s200_s3, %s200_s3 }
  0x43   :  { %v167_v53 = vmul.f32 %v396_v1, %v166_v49  ;;  %v171_v54 = vmul.f32 %v401_v2, %v170_v50  ;;  %v155_v56 = vstv %s442_s13  ;;  %v174_v57 = vstv %s448_s14  ;;  %p297_p4 = scmp.ne.s32.totalorder %s200_s3, %s296_s24  ;;  %p302_p6 = scmp.lt.s32.totalorder %s296_s24, %s296_s24 }
  0x44   :  { %v110_v51 = vmul.f32 %v109_v39, %v107_v44  ;;  %v130_v55 = vmax.f32 %v129_v47, 0.0  ;;  %v91_v58 = vstv %s450_s15  ;;  %v152_v60 = vadd.f32 %v151_v48, %v149_v52 }
  0x45   :  { %v168_v61 = vadd.f32 %v167_v53, %v164_v46  ;;  %v92_v62 = vmul.f32 %v91_v58, %v86_v35  ;;  %v112_v0 = vstv %s454_s16  ;;  %v135_v3 = vstv %s459_s17  ;;  %p303_p7 = por %p302_p6, %p301_p5 }
  0x46   :  { %v114_v59 = vadd.f32 %v110_v51, %v89_v43  ;;  %v133_v63 = vmul.f32 %v132_v41, %v130_v55  ;;  %v158_v4 = vstv %s461_s18  ;;  %v153_v5 = vmax.f32 %v152_v60, 0.0 }
  0x47   :  { %v172_v1 = vadd.f32 %v171_v54, %v168_v61  ;;  %v113_v6 = vmul.f32 %v112_v0, %v107_v44  ;;  %v136_v2 = vmul.f32 %v135_v3, %v130_v55  ;;  %v178_v12 = vstv %s472_s19  ;;  %p304_p8 = pnand %p303_p7, %p297_p4 }
  0x48   :  { %v137_v7 = vadd.f32 %v133_v63, %v114_v59  ;;  %v156_v8 = vmul.f32 %v155_v56, %v153_v5  ;;  %v159_v11 = vmul.f32 %v158_v4, %v153_v5  ;;  %v181_v13 = vstv %s474_s20 }
  0x49   :  { %v175_v9 = vadd.f32 %v174_v57, %v172_v1  ;;  %v115_v10 = vadd.f32 %v113_v6, %v92_v62  ;;  %v186_v20 = vstv %s185_s21  ;;  %v190_v21 = vstv %s242_s22 }
  0x4a   :  { %v160_v14 = vadd.f32 %v156_v8, %v137_v7 }
  0x4b   :  { %v176_v15 = vmax.f32 %v175_v9, 0.0  ;;  %v138_v16 = vadd.f32 %v136_v2, %v115_v10 }
  0x4d   :  { %v179_v17 = vmul.f32 %v178_v12, %v176_v15  ;;  %v161_v18 = vadd.f32 %v159_v11, %v138_v16  ;;  %v182_v19 = vmul.f32 %v181_v13, %v176_v15 }
  0x4f   :  { %v183_v22 = vadd.f32 %v179_v17, %v160_v14  ;;  %v184_v23 = vadd.f32 %v182_v19, %v161_v18 }
  0x51   :  { %v187_v24 = vadd.f32 %v186_v20, %v183_v22  ;;  %v191_v25 = vadd.f32 %v190_v21, %v184_v23 }
  0x53   :  { %188 = vst [vmem:[#allocation10] sm:$0xff] %v187_v24  ;;  %193 = vst [vmem:[#allocation10 + $0x8] sm:$0xff] %v191_v25 }
  0x54   :  { %307 = shalt.err (!%p304_p8)
}
  0x55   :  { %s308_s1 = scalar_lea.hbm %s503_s5, 256 }
  0x56   :  { %p309_p9 = scmp.ne.s32.totalorder %s503_s5, %s308_s1  ;;  %p312_p10 = scmp.lt.u32.totalorder %s308_s1, %s503_s5 }
  0x58   :  { %p314_p11 = pnand %p312_p10, %p309_p9 }
  0x5a   :  { %317 = shalt.err (!%p314_p11)
}
  0x5b   :  { %s331_s30 = smov 128   ;;  %s332_s6 = smov 8  }
  0x5c   :  { %205 = dma.vmem_to_hbm [thread:$0]  %s200_s3, 256, %s503_s5, [#allocation3], %s331_s30, %s331_s30, %s332_s6  }
  0x5d   :  { %324 = dma.done.wait [#allocation3], 256  }
  0x5e   :  { %325 = vsyncadd [#allocation3], 4294967040 }
  0x5f   :  { %209 = vsyncpa [#allocation3], 1 }
  0x60   :  { %210 = vsyncpa [#allocation4], 1 }
  0x61   :  { %211 = vsyncpa [#allocation5], 1 }
  0x62   :  { %212 = vsyncpa [#allocation7], 1 }

</bundles_post_ra>
